<compile_context>
chip_gen: v7x
topology: tpu7x:2x2x1
jax: 0.10.0
libtpu: 0.0.40
codegen_flags: <defaults>
</compile_context>

<pallas_src>
import jax
import jax.numpy as jnp
from jax.experimental import pallas as pl
from jax.experimental.pallas import tpu as pltpu


def _round_up(x, m):
    return (x + m - 1) // m * m


def _conv_mm_kernel(x_ref, w_ref, b_ref, o_ref):
    # x_ref: (1, K, tile_hw)     input dtype   streamed (double-buffered)
    # w_ref: (Cout, K)           bf16          resident across the grid
    # b_ref: (Cout, 1)           f32           resident across the grid
    # o_ref: (1, Cout, tile_hw)  input dtype   lane-dense NCHW output tile
    x = x_ref[0].astype(jnp.bfloat16)                      # cast in VMEM (cheap)
    acc = jnp.dot(w_ref[...], x, preferred_element_type=jnp.float32)
    o_ref[0] = (acc + b_ref[...]).astype(o_ref.dtype)


def _pick_tile_hw(Mo, N, K, Cout, in_bytes, out_bytes,
                  vmem_buf_budget=32 * 1024 * 1024,
                  target_tile_bytes=4 * 1024 * 1024):
    """Pick an hw-tile: multi-MiB tiles, VMEM-aware (v7x 64 MiB safe)."""
    per_col = K * in_bytes + Cout * out_bytes              # bytes per output column
    cap = max(128, vmem_buf_budget // (2 * per_col))       # double-buffered footprint
    target = max(128, target_tile_bytes // per_col)        # amortize per-step overhead
    tile = min(cap, target)
    tile = max(128, (tile // 128) * 128)                   # lane-width multiple
    tile = min(tile, _round_up(Mo, 128))                   # never exceed the problem
    if N == 1 and Mo > 128:
        # keep >=2 parallel grid entries so v7x's 2 TensorCores both get work
        tile = min(tile, max(128, _round_up((Mo + 1) // 2, 128)))
    return tile


def conv1_forward(x, weight, bias=None, *, padding=0, stride=1,
                  dilation=1, groups=1, tile_hw=None):
    """Conv1.forward: plain Conv2d. x: (N,Cin,H,W); weight: (Cout,Cin,KH,KW)."""
    if stride != 1 or dilation != 1 or groups != 1:
        raise NotImplementedError("only stride=1, dilation=1, groups=1 supported")

    N, Cin, H, W = x.shape
    Cout, Cin_w, KH, KW = weight.shape
    assert Cin_w == Cin
    Ho = H + 2 * padding - KH + 1
    Wo = W + 2 * padding - KW + 1
    K = Cin * KH * KW
    Mo = Ho * Wo
    out_dtype = x.dtype

    if bias is None:
        bias = jnp.zeros((Cout,), jnp.float32)

    if KH == 1 and KW == 1 and padding == 0:
        # Default Conv1 path: x is already (Cin=K, H*W=M)-ordered per image.
        cols = x.reshape(N, Cin, H * W)
    else:
        # TODO(synk): replace this HBM im2col with in-kernel tap accumulation.
        xp = x
        if padding > 0:
            xp = jnp.pad(xp, ((0, 0), (0, 0),
                              (padding, padding), (padding, padding)))
        taps = [xp[:, :, kh:kh + Ho, kw:kw + Wo]           # each (N, Cin, Ho, Wo)
                for kh in range(KH) for kw in range(KW)]
        # k index = cin*KH*KW + kh*KW + kw  -> matches weight.reshape(Cout, K)
        cols = jnp.stack(taps, axis=2).reshape(N, K, Mo)

    in_bytes = jnp.dtype(cols.dtype).itemsize
    out_bytes = jnp.dtype(out_dtype).itemsize
    if tile_hw is None:
        tile_hw = _pick_tile_hw(Mo, N, K, Cout, in_bytes, out_bytes)
    assert tile_hw % 128 == 0, "tile_hw must be a multiple of 128 (lane width)"

    # Pad the flattened spatial dim up to a tile multiple (tail sliced off below).
    Mo_pad = _round_up(Mo, tile_hw)
    if Mo_pad != Mo:
        cols = jnp.pad(cols, ((0, 0), (0, 0), (0, Mo_pad - Mo)))

    w_mat = weight.reshape(Cout, K).astype(jnp.bfloat16)   # tiny; matches cols' k order
    b_mat = bias.reshape(Cout, 1).astype(jnp.float32)

    # Double-buffered cols + out tiles, plus resident weights/bias, plus slack.
    vmem_need = (2 * (K * tile_hw * in_bytes + Cout * tile_hw * out_bytes)
                 + Cout * K * 2 + Cout * 4)
    vmem_limit = int(min(max(2 * vmem_need, 16 * 1024 * 1024), 48 * 1024 * 1024))

    out = pl.pallas_call(
        _conv_mm_kernel,
        out_shape=jax.ShapeDtypeStruct((N, Cout, Mo_pad), out_dtype),
        grid_spec=pl.GridSpec(
            grid=(N, Mo_pad // tile_hw),
            in_specs=[
                pl.BlockSpec((1, K, tile_hw), lambda n, i: (n, 0, i)),  # streamed
                pl.BlockSpec((Cout, K), lambda n, i: (0, 0)),           # resident
                pl.BlockSpec((Cout, 1), lambda n, i: (0, 0)),           # resident
            ],
            out_specs=pl.BlockSpec((1, Cout, tile_hw), lambda n, i: (n, 0, i)),
        ),
        compiler_params=pltpu.CompilerParams(
            dimension_semantics=("parallel", "parallel"),  # v7x: shard across 2 TCs
            vmem_limit_bytes=vmem_limit,
        ),
    )(cols, w_mat, b_mat)

    # NCHW already — just a free reshape (no transpose pass).
    return out[:, :, :Mo].reshape(N, Cout, Ho, Wo)


def _conv_ref(x, w, b, padding):
    y = jax.lax.conv_general_dilated(
        x, w, window_strides=(1, 1),
        padding=((padding, padding), (padding, padding)),
        dimension_numbers=("NCHW", "OIHW", "NCHW"))
    return y + b[None, :, None, None]


if __name__ == "__main__":
    key = jax.random.PRNGKey(0)
    kx, kw1, kb1, kw3, kb3 = jax.random.split(key, 5)

    N, Cin, Cout, H, W = 2, 4, 8, 16, 16
    x = jax.random.normal(kx, (N, Cin, H, W), dtype=jnp.float32)

    # --- Conv1 defaults: kernel_size=1, padding=0 (pointwise conv) ---
    bound1 = 1.0 / (Cin * 1 * 1) ** 0.5
    w1 = jax.random.uniform(kw1, (Cout, Cin, 1, 1), jnp.float32, -bound1, bound1)
    b1 = jax.random.uniform(kb1, (Cout,), jnp.float32, -bound1, bound1)
    y1 = conv1_forward(x, w1, b1, padding=0)
    jax.block_until_ready(y1)
    err1 = float(jnp.max(jnp.abs(y1 - _conv_ref(x, w1, b1, 0))))
    assert err1 < 5e-2, f"1x1 conv mismatch vs reference: max err {err1}"

    # --- Conv1 with kernel_size=3, padding=1 (same Pallas kernel) ---
    bound3 = 1.0 / (Cin * 3 * 3) ** 0.5
    w3 = jax.random.uniform(kw3, (Cout, Cin, 3, 3), jnp.float32, -bound3, bound3)
    b3 = jax.random.uniform(kb3, (Cout,), jnp.float32, -bound3, bound3)
    y3 = conv1_forward(x, w3, b3, padding=1)
    jax.block_until_ready(y3)
    err3 = float(jnp.max(jnp.abs(y3 - _conv_ref(x, w3, b3, 1))))
    assert err3 < 5e-2, f"3x3 conv mismatch vs reference: max err {err3}"

    print("KERNEL_OK")
</pallas_src>

<mosaic_0001>
module attributes {stable_mosaic.version = 11 : i64} {
  func.func @_conv_mm_kernel(%arg0: i32, %arg1: i32, %arg2: memref<1x4x256xf32, #tpu.memory_space<vmem>>, %arg3: memref<8x4xbf16, #tpu.memory_space<vmem>>, %arg4: memref<8x1xf32, #tpu.memory_space<vmem>>, %arg5: memref<1x8x256xf32, #tpu.memory_space<vmem>>) attributes {dimension_semantics = [#tpu.dimension_semantics<parallel>, #tpu.dimension_semantics<parallel>], iteration_bounds = array<i64: 2, 1>, scalar_prefetch = 0 : i64, scratch_operands = 0 : i64, tpu.core_type = #tpu.core_type<tc>, window_params = [{transform_indices = @transform_0, window_bounds = array<i64: 1, 4, 256>}, {pipeline_mode = #tpu.pipeline_mode<synchronous>, transform_indices = @transform_1, window_bounds = array<i64: 8, 4>}, {pipeline_mode = #tpu.pipeline_mode<synchronous>, transform_indices = @transform_2, window_bounds = array<i64: 8, 1>}, {transform_indices = @transform_3, window_bounds = array<i64: 1, 8, 256>}]} {
    %c0 = arith.constant 0 : index
    %c0_0 = arith.constant 0 : index
    %c0_1 = arith.constant 0 : index
    %0 = vector.load %arg2[%c0, %c0_0, %c0_1] : memref<1x4x256xf32, #tpu.memory_space<vmem>>, vector<1x4x256xf32>
    %1 = vector.shape_cast %0 : vector<1x4x256xf32> to vector<4x256xf32>
    %2 = arith.truncf %1 : vector<4x256xf32> to vector<4x256xbf16>
    %c0_2 = arith.constant 0 : index
    %c0_3 = arith.constant 0 : index
    %3 = vector.load %arg3[%c0_2, %c0_3] : memref<8x4xbf16, #tpu.memory_space<vmem>>, vector<8x4xbf16>
    %cst = arith.constant dense<0.000000e+00> : vector<8x256xf32>
    %4 = tpu.matmul %3, %2, %cst {dimension_numbers = #tpu.dot_dimension_numbers<[1], [0], [0], [1], [0, 0, 1, 1], [], []>} : vector<8x4xbf16>, vector<4x256xbf16>, vector<8x256xf32> -> vector<8x256xf32>
    %c0_4 = arith.constant 0 : index
    %c0_5 = arith.constant 0 : index
    %5 = vector.load %arg4[%c0_4, %c0_5] : memref<8x1xf32, #tpu.memory_space<vmem>>, vector<8x1xf32>
    %6 = vector.broadcast %5 : vector<8x1xf32> to vector<8x256xf32>
    %7 = arith.addf %4, %6 : vector<8x256xf32>
    %c0_6 = arith.constant 0 : index
    %c0_7 = arith.constant 0 : index
    %c0_8 = arith.constant 0 : index
    %8 = vector.load %arg5[%c0_6, %c0_7, %c0_8] : memref<1x8x256xf32, #tpu.memory_space<vmem>>, vector<1x8x256xf32>
    %9 = vector.shape_cast %8 : vector<1x8x256xf32> to vector<8x256xf32>
    %10 = vector.shape_cast %7 : vector<8x256xf32> to vector<1x8x256xf32>
    tpu.vector_store %arg5[%c0_6, %c0_7, %c0_8], %10 {strides = array<i32>} : memref<1x8x256xf32, #tpu.memory_space<vmem>>, vector<1x8x256xf32>,
    return
  }
  func.func @transform_0(%arg0: i32, %arg1: i32) -> (i32, i32, i32) {
    %c0_i32 = arith.constant 0 : i32
    %c0_i32_0 = arith.constant 0 : i32
    return %arg0, %c0_i32, %arg1 : i32, i32, i32
  }
  func.func @transform_1(%arg0: i32, %arg1: i32) -> (i32, i32) {
    %c0_i32 = arith.constant 0 : i32
    %c0_i32_0 = arith.constant 0 : i32
    %c0_i32_1 = arith.constant 0 : i32
    return %c0_i32, %c0_i32_0 : i32, i32
  }
  func.func @transform_2(%arg0: i32, %arg1: i32) -> (i32, i32) {
    %c0_i32 = arith.constant 0 : i32
    %c0_i32_0 = arith.constant 0 : i32
    %c0_i32_1 = arith.constant 0 : i32
    return %c0_i32, %c0_i32_0 : i32, i32
  }
  func.func @transform_3(%arg0: i32, %arg1: i32) -> (i32, i32, i32) {
    %c0_i32 = arith.constant 0 : i32
    %c0_i32_0 = arith.constant 0 : i32
    return %arg0, %c0_i32, %arg1 : i32, i32, i32
  }
}

</mosaic_0001>

<bundles_post_ra>
// kernel: tpu_custom_call.1
= control target key start
LH: loop header
LB: loop body
LE: loop exit
PB: predicated region body
PF: predicated region fallthrough
CT: control target
= control target key end

     0   :  { %8 = vsyncpa [#allocation3], 0  ;;  %s776_s0 = inlined_call_operand.hbm [shape: f32[2,4,256], index: 0, kind: input, shape index: {}]   ;;  %s777_s1 = inlined_call_operand.vmem [shape: bf16[8,4], index: 1, kind: input, shape index: {}]   ;;  %s778_s2 = inlined_call_operand.vmem [shape: f32[8,1], index: 2, kind: input, shape index: {}]   ;;  %s779_s3 = inlined_call_operand.hbm [shape: f32[2,8,256], index: 3, kind: output, shape index: {}]  }
   0x1   :  { %10 = vsyncpa [#allocation3 + $0x1], 0 }
   0x2   :  { %11 = vsyncpa [#allocation4], 0 }
   0x3   :  { %13 = vsyncpa [#allocation4 + $0x1], 0  ;;  %s597_s12 = smov 0   ;;  %s599_s13 = smov 0  }
   0x4   :  { %s601_s14 = smov 0   ;;  %s603_s15 = smov 0  }
   0x5   :  { %s605_s16 = smov 0   ;;  %s607_s17 = smov 0  }
   0x6 LB: > { %s376_s18 = sadd.s32 4294967295, %s572_s17   ;;  %s377_s19 = sadd.s32 4294967294, %s572_s17   ;;  %s572_s17 = sphi %s607_s17, %s19_s17   ;;  %s568_s16 = sphi %s605_s16, %s795_s16   ;;  %s564_s15 = sphi %s603_s15, %s794_s15   ;;  %s560_s14 = sphi %s601_s14, %s793_s14   ;;  %s556_s13 = sphi %s599_s13, %s792_s13   ;;  %s552_s12 = sphi %s597_s12, %s791_s12  }
   0x7   : > { %s31_s20 = sadd.s32 1, %s568_s16  ;;  %s40_s21 = sadd.s32 1, %s560_s14 }
   0x8   : > { %p33_p0 = scmp.ge.s32.totalorder %s31_s20, 2  ;;  %p47_p1 = scmp.ne.s32.totalorder %s560_s14, %s556_s13 }
   0x9   : > { %p48_p2 = scmp.eq.s32.totalorder %s572_s17, 0  ;;  %p53_p3 = scmp.ne.s32.totalorder %s556_s13, %s552_s12 }
   0xa   : > { %s797_s20 = smov (%p33_p0, %s31_s20), 0  ;;  %p54_p5 = scmp.eq.s32.totalorder %s376_s18, 0 }
   0xb   : > { %p638_p4 = por %p48_p2, %p47_p1  ;;  %s35_s23 = ssub.s32 %s568_s16, %s797_s20 }
   0xc   : > { %p121_p6 = scmp.eq.s32.totalorder %s376_s18, 1  ;;  %p38_p7 = scmp.eq.s32.totalorder %s35_s23, 0 }
   0xd   : > { %p644_p8 = por %p54_p5, %p53_p3  ;;  %p127_p10 = scmp.eq.s32.totalorder %s377_s19, 1 }
   0xe   : > { %p648_p9 = por %p121_p6, %p47_p1  ;;  %p407_p13 = scmp.lt.s32.totalorder %s572_s17, 2 }
   0xf   : > { %s653_s26 = scalar_select %p38_p7, %s560_s14, %s40_s21  }
  0x10   : > { %s783_s25 = scalar_select %p648_p9, 1, 0 }
  0x11   : > { %p655_p11 = por %p127_p10, %p53_p3  ;;  %s153_s28 = sand.u32 1, %s560_s14  }
  0x12   : > { %s380_s29 = sshll.u32 %s153_s28, 3  ;;  %s393_s30 = sshll.u32 %s568_s16, 7 }
  0x13   : > { %s784_s27 = scalar_select %p655_p11, 1, 0 }
  0x14   : > { %s666_s6 = scalar_lea.hbm %s776_s0, %s393_s30  ;;  %s157_s7 = scalar_lea.vmem [#allocation2], %s380_s29 }
  0x15   : > { %s167_s8 = sshll.u32 %s157_s7, 4  ;;  %p672_p0 = pnand %p407_p13, %p638_p4  ;;  %s668_s8 = int_to_ptr.vmem [resolvable:$true] %s167_s8 }
  0x16   : > { %s154_s10 = scalar_lea.sflag [#allocation3], %s153_s28  ;;  %s460_s11 = scalar_lea.hbm %s666_s6, 128 }
  0x17   : > { %p461_p3 = scmp.ne.s32.totalorder %s666_s6, %s460_s11  ;;  %p462_p5 = pneg %p672_p0 }
  0x18   : > { %s465_s21 = scalar_lea.hbm %s776_s0, 256  ;;  %p466_p4 = scmp.lt.u32.totalorder %s666_s6, %s776_s0 }
  0x19   : > { %p463_p6 = pnand %p462_p5, %p461_p3  ;;  %p467_p10 = scmp.lt.u32.totalorder %s465_s21, %s460_s11 }
  0x1a   : > { %p469_p12 = scmp.lt.u32.totalorder %s460_s11, %s666_s6 }
  0x1b   : > { %p464_p7 = pneg %p463_p6  ;;  %p468_p13 = por %p467_p10, %p466_p4 }
  0x1d   : > { %p470_p1 = por %p469_p12, %p468_p13 }
  0x1f   : > { %p471_p2 = pnand %p470_p1, %p464_p7 }
  0x21   : > { %474 = shalt.err (!%p471_p2)
}
  0x22   : > { %s475_s28 = scalar_lea.vmem %s668_s8, 128  ;;  %s574_s29 = smov [#allocation2]  }
  0x23   : > { %p476_p3 = scmp.ne.s32.totalorder %s668_s8, %s475_s28  ;;  %s480_s30 = sshll.u32 %s574_s29, 4  ;;  %s481_s30 = int_to_ptr.vmem [resolvable:$false] %s480_s30 }
  0x24   : > { %s482_s4 = scalar_lea.vmem %s481_s30, 256  ;;  %p483_p9 = scmp.lt.s32.totalorder %s668_s8, %s481_s30 }
  0x25   : > { %p478_p6 = pnand %p476_p3, %p462_p5  ;;  %p484_p4 = scmp.lt.s32.totalorder %s482_s4, %s475_s28 }
  0x27   : > { %p479_p11 = pneg %p478_p6  ;;  %p485_p10 = por %p484_p4, %p483_p9 }
  0x29   : > { %p486_p12 = pnand %p485_p10, %p479_p11 }
  0x2b   : > { %489 = shalt.err (!%p486_p12)
}
  0x2c   : > { %402 = dma.hbm_to_vmem [thread:$0]  (!%p672_p0), %s666_s6, 128, %s668_s8, %s154_s10  }
  0x2d   : > { %p786_p1 = scmp.lt.s32.totalorder %s572_s17, 3  ;;  %p787_p2 = scmp.ge.s32.totalorder %s572_s17, 1 }
  0x2f   : > { %p173_p5 = pnand %p787_p2, %p786_p1 }
  0x30   : > { %s708_s5 = sand.u32 (!%p173_p5), 1, %s556_s13  }
  0x31   : > { %176 = sbr.rel (%p173_p5) target bundleno = 295 (0x127), region = 32  ;;  %s384_s7 = sshll.u32 (!%p173_p5), %s708_s5, 3 }
  0x32   : > { %s179_s11 = scalar_lea.sflag (!%p173_p5), [#allocation3], %s708_s5  ;;  %s182_s18 = scalar_lea.vmem (!%p173_p5), [#allocation2], %s384_s7 }
  0x38   : > { %543 = dma.done.wait (%p644_p8), %s179_s11, 128  }
  0x39   : > { %545 = vsyncadd (%p644_p8), %s179_s11, 4294967168  ;;  %v575_v0 = vmov 0   ;;  %v208_v1 = vld [vmem:[%s182_s18] sm:$0xff]  ;;  %vm225_vm0 = vcmask 1041408   ;;  %vm221_vm1 = vcmask 31744   ;;  %s385_s10 = sshll.u32 %s708_s5, 4 }
  0x3a   : > { %264 = vmatprep.mubr.bf16.mxu0 %v575_v0  ;;  %458 = vset.pattern.permute.xlu0 %v575_v0  ;;  %v215_v2 = vld [vmem:[%s778_s2] sm:$0xff]  ;;  %v210_v3 = vcombine.high %v208_v1, %v208_v1  ;;  %v212_v4 = vpack.c.bf16 %v208_v1, %v208_v1  ;;  %s394_s19 = sshll.u32 %s564_s15, 8  ;;  %s204_s21 = scalar_lea.vmem [#allocation5], %s385_s10 }
  0x3b   : > { %218 = vperm.xlu0 %458, %v215_v2   ;;  %v214_v7 = vld [vmem:[%s777_s1] sm:$0xf]  ;;  %s292_s22 = sshll.u32 %s204_s21, 4  ;;  %s727_s29 = scalar_lea.hbm %s779_s3, %s394_s19  ;;  %s729_s22 = int_to_ptr.vmem [resolvable:$true] %s292_s22 }
  0x3c   : > { %v213_v5 = vpack.c.bf16 %v210_v3, %v210_v3  ;;  %v227_v6 = vsel %vm225_vm0, %v212_v4, 0  ;;  %s276_s15 = scalar_lea.sflag [#allocation4], %s708_s5  ;;  %s490_s30 = scalar_lea.vmem %s729_s22, 256 }
  0x3d   : > { %p491_p8 = scmp.ne.s32.totalorder %s729_s22, %s490_s30  ;;  %p788_p9 = scmp.ne.s32.totalorder %s783_s25, 0 }
  0x3e   : > { %386 = vmatprep.subr.msk.bf16.mxu0 %vm225_vm0, %v213_v5  ;;  %s576_s4 = smov [#allocation5]  }
  0x3f   : > { %233 = vmatpush1.bf16.msra.mxu0 %v227_v6  ;;  %p492_p11 = pnand %p491_p8, %p788_p9  ;;  %s494_s7 = sshll.u32 %s576_s4, 4  ;;  %s495_s7 = int_to_ptr.vmem [resolvable:$false] %s494_s7 }
  0x40   : > { %s496_s11 = scalar_lea.vmem %s495_s7, 512  ;;  %p497_p7 = scmp.lt.s32.totalorder %s729_s22, %s495_s7 }
  0x41   : > { %p493_p0 = pneg %p492_p11  ;;  %p498_p13 = scmp.lt.s32.totalorder %s496_s11, %s490_s30 }
  0x42   : > { %387 = vmatmul.mubr.msk.bf16.vlgmr.msra.gmra.mrb[0].mxu0 %vm221_vm1, %v214_v7 }
  0x43   : > { %p499_p3 = por %p498_p13, %p497_p7 }
  0x45   : > { %p500_p6 = pnand %p499_p3, %p493_p0 }
  0xba   : > { %v219_v8 = vpop.permute.xlu0 %218 }
 0x115   : > { %v266_v9 = vpop.f32.mrb[0].mxu0 }
 0x116   : > { %v267_v10 = vadd.f32 %v266_v9, %v219_v8  ;;  %v268_v11 = vpop.f32.mrb[1].mxu0 }
 0x117   : > { %v269_v12 = vadd.f32 %v268_v11, %v219_v8  ;;  %v270_v13 = vpop.f32.mrb[2].mxu0 }
 0x118   : > { %273 = vst [vmem:[%s204_s21] sm:$0xff] %v267_v10  ;;  %v271_v14 = vpop.f32.mrb[3].mxu0 }
 0x119   : > { %274 = vst [vmem:[%s204_s21 + $0x8] sm:$0xff] %v269_v12 }
 0x11a   : > { %503 = shalt.err (!%p500_p6)
}
 0x11b   : > { %s504_s5 = scalar_lea.hbm %s727_s29, 256  ;;  %s508_s8 = scalar_lea.hbm %s779_s3, 512 }
 0x11c   : > { %p505_p4 = scmp.ne.s32.totalorder %s727_s29, %s504_s5  ;;  %p509_p1 = scmp.lt.u32.totalorder %s727_s29, %s779_s3 }
 0x11d   : > { %p510_p2 = scmp.lt.u32.totalorder %s508_s8, %s504_s5  ;;  %p512_p8 = scmp.lt.u32.totalorder %s504_s5, %s727_s29 }
 0x11e   : > { %p506_p10 = pnand %p505_p4, %p788_p9 }
 0x11f   : > { %p511_p5 = por %p510_p2, %p509_p1 }
 0x120   : > { %p507_p12 = pneg %p506_p10 }
 0x121   : > { %p513_p11 = por %p512_p8, %p511_p5 }
 0x123   : > { %p514_p0 = pnand %p513_p11, %p507_p12 }
 0x125   : > { %517 = shalt.err (!%p514_p0)
}
 0x126   : > { %397 = dma.vmem_to_hbm [thread:$0]  (%p788_p9), %s729_s22, 256, %s727_s29, %s276_s15  }
 0x127 PF: > { %s304_s10 = sand.u32 1, %s552_s12   ;;  %p789_p7 = scmp.ne.s32.totalorder %s784_s27, 0 }
 0x128   : > { %p790_p13 = scmp.ge.s32.totalorder %s572_s17, 2  ;;  %s305_s19 = scalar_lea.sflag [#allocation4], %s304_s10 }
 0x12a   : > { %p404_p3 = pnand %p790_p13, %p789_p7 }
 0x12c   : > { %547 = dma.done.wait (!%p404_p3), %s305_s19, 256  }
 0x12d   : > { %549 = vsyncadd (!%p404_p3), %s305_s19, 4294967040  ;;  %s19_s17 = sadd.s32 1, %s572_s17   ;;  %s791_s12 = smov %s556_s13 }
 0x12e   : > { %p16_p6 = scmp.ge.s32.totalorder %s19_s17, 4   ;;  %s792_s13 = smov %s560_s14 }
 0x12f   : > { %s793_s14 = smov %s653_s26  ;;  %s794_s15 = smov %s568_s16 }
 0x130   : > { %s795_s16 = smov %s797_s20  ;;  %18 = sbr.rel (!%p16_p6) target bundleno = 6 (0x6), region = 77 }
 0x137   :  { %310 = vsyncpa [#allocation3], 1 }
 0x138   :  { %312 = vsyncpa [#allocation3 + $0x1], 1 }
 0x139   :  { %313 = vsyncpa [#allocation4], 1 }
 0x13a   :  { %315 = vsyncpa [#allocation4 + $0x1], 1 }

</bundles_post_ra>
